<compile_context>
chip_gen: v7x
topology: tpu7x:2x2x1
jax: 0.10.0
libtpu: 0.0.40
codegen_flags: <defaults>
</compile_context>

<pallas_src>
import jax
import jax.numpy as jnp
from jax.experimental import pallas as pl
from jax.experimental.pallas import tpu as pltpu


# Conservative double-buffered-activation VMEM budget: stays under the scoped
# VMEM default on every generation (v5e 16 MiB / v6e 32 MiB / v7x 32 MiB).
_VMEM_ACT_BUDGET = 12 * 1024 * 1024


def _round_up(x, m):
    return (x + m - 1) // m * m


def recognition_rnn_kernel(xT_ref, hT_ref, w1x_ref, w1h_ref, b1_ref,
                           w2_ref, b2_ref, outT_ref, hnewT_ref):
    # xT_ref:    (obs_dim, TB)            batch on the lane axis
    # hT_ref:    (nhidden, TB)
    # w1x_ref:   (nhidden, obs_dim)       i2h weight, x columns (PyTorch layout)
    # w1h_ref:   (nhidden, nhidden)       i2h weight, h columns
    # b1_ref:    (nhidden, 1)
    # w2_ref:    (2*latent_dim, nhidden)  h2o weight (PyTorch layout)
    # b2_ref:    (2*latent_dim, 1)
    # outT_ref:  (2*latent_dim, TB)
    # hnewT_ref: (nhidden, TB)            aliased onto hT's HBM buffer
    pre = (jnp.dot(w1x_ref[...], xT_ref[...], preferred_element_type=jnp.float32)
           + jnp.dot(w1h_ref[...], hT_ref[...], preferred_element_type=jnp.float32)
           + b1_ref[...].astype(jnp.float32))
    h_new = jnp.tanh(pre)                                        # f32 on the EUP
    out = (jnp.dot(w2_ref[...], h_new, preferred_element_type=jnp.float32)
           + b2_ref[...].astype(jnp.float32))
    hnewT_ref[...] = h_new.astype(hnewT_ref.dtype)
    outT_ref[...] = out.astype(outT_ref.dtype)


def prep_recognition_rnn_params(w_i2h, b_i2h, w_h2o, b_h2o, obs_dim):
    """Hoist the i2h split / bias reshapes out of the per-timestep call."""
    nhidden = w_i2h.shape[0]
    out_dim = w_h2o.shape[0]
    return (w_i2h[:, :obs_dim],            # (nhidden, obs_dim)
            w_i2h[:, obs_dim:],            # (nhidden, nhidden)
            b_i2h.reshape(nhidden, 1),
            w_h2o,                         # (out_dim, nhidden)
            b_h2o.reshape(out_dim, 1))


def _select_batch_tile(n, batch_tile, num_parallel_tiles, bytes_per_col_2buf):
    # Largest 128-aligned tile keeping double-buffered activations in budget.
    max_tb = max(128, (_VMEM_ACT_BUDGET // bytes_per_col_2buf) // 128 * 128)
    tb_cap = max_tb if batch_tile is None else min(batch_tile, max_tb)
    if num_parallel_tiles > 1 and n > 128 * num_parallel_tiles:
        # v7x megacore: produce >= num_parallel_tiles 128-aligned "parallel"
        # grid steps so every TensorCore gets work.
        return min(tb_cap, _round_up(pl.cdiv(n, num_parallel_tiles), 128))
    if n <= tb_cap:
        return n          # single full-extent block (no lane-alignment needed)
    return tb_cap         # multiple of 128; ragged tail handled by Pallas


def recognition_rnn_step_t(xT, hT, prepped_params, *, batch_tile=None,
                           num_parallel_tiles=1):
    """One RNN step in persistent transposed layout.

    xT: (obs_dim, N), hT: (nhidden, N) ->
        (outT: (2*latent_dim, N), hnewT: (nhidden, N)).

    Keep activations in this (features, N) layout across a recurrence so no
    per-step transposes round-trip HBM.  hT's buffer is aliased to hnewT
    (donate it from the caller for an in-place hidden-state update).
    """
    w1x, w1h, b1, w2, b2 = prepped_params
    obs_dim, n = xT.shape
    nhidden = hT.shape[0]
    out_dim = w2.shape[0]

    itemsize = max(jnp.dtype(xT.dtype).itemsize, jnp.dtype(hT.dtype).itemsize)
    bytes_per_col_2buf = 2 * itemsize * (_round_up(obs_dim, 8)
                                         + 2 * _round_up(nhidden, 8)
                                         + _round_up(out_dim, 8))
    tb = _select_batch_tile(n, batch_tile, num_parallel_tiles, bytes_per_col_2buf)
    grid = (pl.cdiv(n, tb),)

    outT, hnewT = pl.pallas_call(
        recognition_rnn_kernel,
        out_shape=(
            jax.ShapeDtypeStruct((out_dim, n), xT.dtype),
            jax.ShapeDtypeStruct((nhidden, n), hT.dtype),
        ),
        grid_spec=pltpu.PrefetchScalarGridSpec(
            num_scalar_prefetch=0,
            grid=grid,
            in_specs=[
                pl.BlockSpec((obs_dim, tb), lambda i: (0, i)),        # x^T   streamed
                pl.BlockSpec((nhidden, tb), lambda i: (0, i)),        # h^T   streamed
                pl.BlockSpec((nhidden, obs_dim), lambda i: (0, 0)),   # W1x   resident
                pl.BlockSpec((nhidden, nhidden), lambda i: (0, 0)),   # W1h   resident
                pl.BlockSpec((nhidden, 1), lambda i: (0, 0)),         # b1    resident
                pl.BlockSpec((out_dim, nhidden), lambda i: (0, 0)),   # W2    resident
                pl.BlockSpec((out_dim, 1), lambda i: (0, 0)),         # b2    resident
            ],
            out_specs=(
                pl.BlockSpec((out_dim, tb), lambda i: (0, i)),        # out^T
                pl.BlockSpec((nhidden, tb), lambda i: (0, i)),        # h_new^T
            ),
        ),
        input_output_aliases={1: 1},   # h^T HBM buffer reused for h_new^T
        compiler_params=pltpu.CompilerParams(
            dimension_semantics=("parallel",),   # batch tiles are independent
        ),
    )(xT, hT, w1x, w1h, b1, w2, b2)
    return outT, hnewT


def recognition_rnn_forward(x, h, w_i2h, b_i2h, w_h2o, b_h2o, *,
                            batch_tile=None, num_parallel_tiles=1):
    """PyTorch-layout wrapper: x (N, obs_dim), h (N, nhidden) ->
    (out (N, 2*latent_dim), h_new (N, nhidden)).

    For a T-step recurrence, use prep_recognition_rnn_params +
    recognition_rnn_step_t directly so transposes and weight prep are paid once
    outside the time loop rather than per step.
    """
    obs_dim = x.shape[1]
    prepped = prep_recognition_rnn_params(w_i2h, b_i2h, w_h2o, b_h2o, obs_dim)
    outT, hnewT = recognition_rnn_step_t(x.T, h.T, prepped,
                                         batch_tile=batch_tile,
                                         num_parallel_tiles=num_parallel_tiles)
    return outT.T, hnewT.T


def init_hidden(nbatch, nhidden=25, dtype=jnp.float32):
    return jnp.zeros((nbatch, nhidden), dtype)


def init_recognition_rnn_params(key, latent_dim=4, obs_dim=2, nhidden=25):
    """nn.Linear-style uniform(-1/sqrt(fan_in), 1/sqrt(fan_in)) init, PyTorch layout."""
    k1, k2, k3, k4 = jax.random.split(key, 4)
    fan1 = obs_dim + nhidden
    bound1 = 1.0 / jnp.sqrt(jnp.float32(fan1))
    bound2 = 1.0 / jnp.sqrt(jnp.float32(nhidden))
    w_i2h = jax.random.uniform(k1, (nhidden, fan1), jnp.float32, -bound1, bound1)
    b_i2h = jax.random.uniform(k2, (nhidden,), jnp.float32, -bound1, bound1)
    w_h2o = jax.random.uniform(k3, (2 * latent_dim, nhidden), jnp.float32, -bound2, bound2)
    b_h2o = jax.random.uniform(k4, (2 * latent_dim,), jnp.float32, -bound2, bound2)
    return w_i2h, b_i2h, w_h2o, b_h2o


def _reference(x, h, w_i2h, b_i2h, w_h2o, b_h2o):
    combined = jnp.concatenate([x, h], axis=1)
    h_new = jnp.tanh(combined @ w_i2h.T + b_i2h)
    out = h_new @ w_h2o.T + b_h2o
    return out, h_new


if __name__ == "__main__":
    latent_dim, obs_dim, nhidden, nbatch = 4, 2, 25, 16

    key = jax.random.PRNGKey(0)
    kx, kh, kp, kx2, kh2 = jax.random.split(key, 5)
    w_i2h, b_i2h, w_h2o, b_h2o = init_recognition_rnn_params(kp, latent_dim, obs_dim, nhidden)

    # --- Small-batch test via the PyTorch-layout wrapper (single full block). ---
    x = jax.random.normal(kx, (nbatch, obs_dim), jnp.float32)
    h = jax.random.normal(kh, (nbatch, nhidden), jnp.float32)
    out, h_new = recognition_rnn_forward(x, h, w_i2h, b_i2h, w_h2o, b_h2o)
    out, h_new = jax.block_until_ready((out, h_new))
    out_ref, h_ref = _reference(x, h, w_i2h, b_i2h, w_h2o, b_h2o)
    assert out.shape == (nbatch, 2 * latent_dim)
    assert h_new.shape == (nbatch, nhidden)
    assert jnp.allclose(h_new, h_ref, atol=1e-4, rtol=1e-4)
    assert jnp.allclose(out, out_ref, atol=1e-4, rtol=1e-4)

    # --- Larger ragged-batch test via the persistent-layout path: multi-tile
    #     grid (megacore-style 2-way split), ragged final tile, hoisted weight
    #     prep, and the h -> h_new alias. ---
    n2 = 1000
    x2 = jax.random.normal(kx2, (n2, obs_dim), jnp.float32)
    h2 = jax.random.normal(kh2, (n2, nhidden), jnp.float32)
    prepped = prep_recognition_rnn_params(w_i2h, b_i2h, w_h2o, b_h2o, obs_dim)
    outT2, hnewT2 = recognition_rnn_step_t(x2.T, h2.T, prepped,
                                           batch_tile=512, num_parallel_tiles=2)
    outT2, hnewT2 = jax.block_until_ready((outT2, hnewT2))
    out2_ref, h2_ref = _reference(x2, h2, w_i2h, b_i2h, w_h2o, b_h2o)
    assert jnp.allclose(hnewT2.T, h2_ref, atol=1e-4, rtol=1e-4)
    assert jnp.allclose(outT2.T, out2_ref, atol=1e-4, rtol=1e-4)

    print("KERNEL_OK")
</pallas_src>

<mosaic_0001>
module attributes {stable_mosaic.version = 11 : i64} {
  func.func @recognition_rnn_kernel(%arg0: i32, %arg1: memref<2x16xf32, #tpu.memory_space<vmem>>, %arg2: memref<25x16xf32, #tpu.memory_space<vmem>>, %arg3: memref<25x2xf32, #tpu.memory_space<vmem>>, %arg4: memref<25x25xf32, #tpu.memory_space<vmem>>, %arg5: memref<25x1xf32, #tpu.memory_space<vmem>>, %arg6: memref<8x25xf32, #tpu.memory_space<vmem>>, %arg7: memref<8x1xf32, #tpu.memory_space<vmem>>, %arg8: memref<8x16xf32, #tpu.memory_space<vmem>>, %arg9: memref<25x16xf32, #tpu.memory_space<vmem>>) attributes {dimension_semantics = [#tpu.dimension_semantics<parallel>], iteration_bounds = array<i64: 1>, scalar_prefetch = 0 : i64, scratch_operands = 0 : i64, tpu.core_type = #tpu.core_type<tc>, window_params = [{transform_indices = @transform_0, window_bounds = array<i64: 2, 16>}, {transform_indices = @transform_1, window_bounds = array<i64: 25, 16>}, {pipeline_mode = #tpu.pipeline_mode<synchronous>, transform_indices = @transform_2, window_bounds = array<i64: 25, 2>}, {pipeline_mode = #tpu.pipeline_mode<synchronous>, transform_indices = @transform_3, window_bounds = array<i64: 25, 25>}, {pipeline_mode = #tpu.pipeline_mode<synchronous>, transform_indices = @transform_4, window_bounds = array<i64: 25, 1>}, {pipeline_mode = #tpu.pipeline_mode<synchronous>, transform_indices = @transform_5, window_bounds = array<i64: 8, 25>}, {pipeline_mode = #tpu.pipeline_mode<synchronous>, transform_indices = @transform_6, window_bounds = array<i64: 8, 1>}, {transform_indices = @transform_7, window_bounds = array<i64: 8, 16>}, {transform_indices = @transform_8, window_bounds = array<i64: 25, 16>}]} {
    %c0 = arith.constant 0 : index
    %c0_0 = arith.constant 0 : index
    %0 = vector.load %arg3[%c0, %c0_0] : memref<25x2xf32, #tpu.memory_space<vmem>>, vector<25x2xf32>
    %c0_1 = arith.constant 0 : index
    %c0_2 = arith.constant 0 : index
    %1 = vector.load %arg1[%c0_1, %c0_2] : memref<2x16xf32, #tpu.memory_space<vmem>>, vector<2x16xf32>
    %cst = arith.constant dense<0.000000e+00> : vector<25x16xf32>
    %2 = tpu.matmul %0, %1, %cst {dimension_numbers = #tpu.dot_dimension_numbers<[1], [0], [0], [1], [0, 0, 1, 1], [], []>} : vector<25x2xf32>, vector<2x16xf32>, vector<25x16xf32> -> vector<25x16xf32>
    %c0_3 = arith.constant 0 : index
    %c0_4 = arith.constant 0 : index
    %3 = vector.load %arg4[%c0_3, %c0_4] : memref<25x25xf32, #tpu.memory_space<vmem>>, vector<25x25xf32>
    %c0_5 = arith.constant 0 : index
    %c0_6 = arith.constant 0 : index
    %4 = vector.load %arg2[%c0_5, %c0_6] : memref<25x16xf32, #tpu.memory_space<vmem>>, vector<25x16xf32>
    %cst_7 = arith.constant dense<0.000000e+00> : vector<25x16xf32>
    %5 = tpu.matmul %3, %4, %cst_7 {dimension_numbers = #tpu.dot_dimension_numbers<[1], [0], [0], [1], [0, 0, 1, 1], [], []>} : vector<25x25xf32>, vector<25x16xf32>, vector<25x16xf32> -> vector<25x16xf32>
    %6 = arith.addf %2, %5 : vector<25x16xf32>
    %c0_8 = arith.constant 0 : index
    %c0_9 = arith.constant 0 : index
    %7 = vector.load %arg5[%c0_8, %c0_9] : memref<25x1xf32, #tpu.memory_space<vmem>>, vector<25x1xf32>
    %8 = vector.broadcast %7 : vector<25x1xf32> to vector<25x16xf32>
    %9 = arith.addf %6, %8 : vector<25x16xf32>
    %10 = math.tanh %9 : vector<25x16xf32>
    %c0_10 = arith.constant 0 : index
    %c0_11 = arith.constant 0 : index
    %11 = vector.load %arg6[%c0_10, %c0_11] : memref<8x25xf32, #tpu.memory_space<vmem>>, vector<8x25xf32>
    %cst_12 = arith.constant dense<0.000000e+00> : vector<8x16xf32>
    %12 = tpu.matmul %11, %10, %cst_12 {dimension_numbers = #tpu.dot_dimension_numbers<[1], [0], [0], [1], [0, 0, 1, 1], [], []>} : vector<8x25xf32>, vector<25x16xf32>, vector<8x16xf32> -> vector<8x16xf32>
    %c0_13 = arith.constant 0 : index
    %c0_14 = arith.constant 0 : index
    %13 = vector.load %arg7[%c0_13, %c0_14] : memref<8x1xf32, #tpu.memory_space<vmem>>, vector<8x1xf32>
    %14 = vector.broadcast %13 : vector<8x1xf32> to vector<8x16xf32>
    %15 = arith.addf %12, %14 : vector<8x16xf32>
    %c0_15 = arith.constant 0 : index
    %c0_16 = arith.constant 0 : index
    %16 = vector.load %arg9[%c0_15, %c0_16] : memref<25x16xf32, #tpu.memory_space<vmem>>, vector<25x16xf32>
    tpu.vector_store %arg9[%c0_15, %c0_16], %10 {strides = array<i32>} : memref<25x16xf32, #tpu.memory_space<vmem>>, vector<25x16xf32>,
    %c0_17 = arith.constant 0 : index
    %c0_18 = arith.constant 0 : index
    %17 = vector.load %arg8[%c0_17, %c0_18] : memref<8x16xf32, #tpu.memory_space<vmem>>, vector<8x16xf32>
    tpu.vector_store %arg8[%c0_17, %c0_18], %15 {strides = array<i32>} : memref<8x16xf32, #tpu.memory_space<vmem>>, vector<8x16xf32>,
    return
  }
  func.func @transform_0(%arg0: i32) -> (i32, i32) {
    %c0_i32 = arith.constant 0 : i32
    %c0_i32_0 = arith.constant 0 : i32
    return %c0_i32, %arg0 : i32, i32
  }
  func.func @transform_1(%arg0: i32) -> (i32, i32) {
    %c0_i32 = arith.constant 0 : i32
    %c0_i32_0 = arith.constant 0 : i32
    return %c0_i32, %arg0 : i32, i32
  }
  func.func @transform_2(%arg0: i32) -> (i32, i32) {
    %c0_i32 = arith.constant 0 : i32
    %c0_i32_0 = arith.constant 0 : i32
    %c0_i32_1 = arith.constant 0 : i32
    return %c0_i32, %c0_i32_0 : i32, i32
  }
  func.func @transform_3(%arg0: i32) -> (i32, i32) {
    %c0_i32 = arith.constant 0 : i32
    %c0_i32_0 = arith.constant 0 : i32
    %c0_i32_1 = arith.constant 0 : i32
    return %c0_i32, %c0_i32_0 : i32, i32
  }
  func.func @transform_4(%arg0: i32) -> (i32, i32) {
    %c0_i32 = arith.constant 0 : i32
    %c0_i32_0 = arith.constant 0 : i32
    %c0_i32_1 = arith.constant 0 : i32
    return %c0_i32, %c0_i32_0 : i32, i32
  }
  func.func @transform_5(%arg0: i32) -> (i32, i32) {
    %c0_i32 = arith.constant 0 : i32
    %c0_i32_0 = arith.constant 0 : i32
    %c0_i32_1 = arith.constant 0 : i32
    return %c0_i32, %c0_i32_0 : i32, i32
  }
  func.func @transform_6(%arg0: i32) -> (i32, i32) {
    %c0_i32 = arith.constant 0 : i32
    %c0_i32_0 = arith.constant 0 : i32
    %c0_i32_1 = arith.constant 0 : i32
    return %c0_i32, %c0_i32_0 : i32, i32
  }
  func.func @transform_7(%arg0: i32) -> (i32, i32) {
    %c0_i32 = arith.constant 0 : i32
    %c0_i32_0 = arith.constant 0 : i32
    return %c0_i32, %arg0 : i32, i32
  }
  func.func @transform_8(%arg0: i32) -> (i32, i32) {
    %c0_i32 = arith.constant 0 : i32
    %c0_i32_0 = arith.constant 0 : i32
    return %c0_i32, %arg0 : i32, i32
  }
}

</mosaic_0001>

<bundles_post_ra>
// kernel: tpu_custom_call.1
= control target key start
LH: loop header
LB: loop body
LE: loop exit
PB: predicated region body
PF: predicated region fallthrough
CT: control target
= control target key end

     0   :  { %vm55_vm0 = vcmask 1040384   ;;  %vm157_vm1 = vcmask 1041408   ;;  %vm144_vm2 = vcmask 15360   ;;  %vm510_vm3 = vmmov 1   ;;  %s665_s0 = inlined_call_operand.vmem [shape: f32[2,16], index: 0, kind: input, shape index: {}]   ;;  %s666_s1 = inlined_call_operand.vmem [shape: f32[25,16], index: 1, kind: input, shape index: {}, may-alias: {1,8}]   ;;  %s667_s2 = inlined_call_operand.vmem [shape: f32[25,2], index: 2, kind: input, shape index: {}]   ;;  %s668_s3 = inlined_call_operand.vmem [shape: f32[25,25], index: 3, kind: input, shape index: {}]   ;;  %s669_s4 = inlined_call_operand.vmem [shape: f32[25,1], index: 4, kind: input, shape index: {}]   ;;  %s670_s5 = inlined_call_operand.vmem [shape: f32[8,25], index: 5, kind: input, shape index: {}]   ;;  %s671_s6 = inlined_call_operand.vmem [shape: f32[8,1], index: 6, kind: input, shape index: {}]   ;;  %s672_s7 = inlined_call_operand.hbm [shape: f32[8,16], index: 7, kind: output, shape index: {0}]   ;;  %s673_s8 = inlined_call_operand.vmem [shape: f32[25,16], index: 8, kind: output, shape index: {1}, may-alias: {1,8}]  }
   0x1   :  { %v38_v0 = vld [vmem:[%s666_s1] sm:$0xff]  ;;  %v39_v1 = vld [vmem:[%s666_s1 + $0x8] sm:$0xff]  ;;  %v40_v2 = vld [vmem:[%s666_s1 + $0x10] sm:$0xff]  ;;  %vm42_vm5 = vcmask 203776   ;;  %v511_v13 = vmov 0  }
   0x2   :  { %v449_v3 = vpack.c.bf16 %v39_v1, %v38_v0  ;;  %v41_v4 = vld [vmem:[%s666_s1 + $0x18] sm:$0x1]  ;;  %v33_v5 = vld [vmem:[%s665_s0] sm:$0x3]  ;;  %vm576_vm4 = vmpackc.low %vm55_vm0, %vm510_vm3  ;;  %476 = vset.pattern.permute.xlu0 %v511_v13 }
   0x3   :  { %v453_v6 = vpack.c.bf16 %v41_v4, %v40_v2  ;;  %430 = vmatprep.subr.msk.mxu1 %vm157_vm1, %v33_v5  ;;  %v29_v8 = vld [vmem:[%s667_s2] sm:$0xff]  ;;  %v30_v10 = vld [vmem:[%s667_s2 + $0x8] sm:$0xff]  ;;  %v31_v11 = vld [vmem:[%s667_s2 + $0x10] sm:$0xff] }
   0x4   :  { %v34_v9 = vld [vmem:[%s668_s3] sm:$0xff]  ;;  %450 = vmatprep.subr.bf16.mxu0 %v449_v3  ;;  %431 = vmatpush3.msk.msra.mxu1 %vm157_vm1, %v33_v5  ;;  %v248_v14 = vld [vmem:[%s669_s4 + $0x10] sm:$0xff] }
   0x5   :  { %452 = vmatpush3.bf16.msra.mxu0 %v449_v3  ;;  %432 = vmatprep.mubr.msk.f32.mxu1 %vm144_vm2, %v29_v8  ;;  %v246_v12 = vld [vmem:[%s669_s4] sm:$0xff] }
   0x6   :  { %455 = vmatprep.subr.msk.bf16.mxu0 %vm576_vm4, %v453_v6  ;;  %424 = vmatprep.mubr.msk.f32.mxu0 %vm42_vm5, %v34_v9 }
   0x7   :  { %433 = vmatmul.mubr.msk.f32.vlgmr.msra.gmra.mrb[0].mxu1 %vm144_vm2, %v30_v10 }
   0x8   :  { %14 = vsyncpa [#allocation3], 0  ;;  %435 = vmatprep.mubr.msk.f32.mxu1 %vm144_vm2, %v31_v11  ;;  %v32_v15 = vld [vmem:[%s667_s2 + $0x18] sm:$0x1]  ;;  %252 = vperm.xlu0 %476, %v246_v12   ;;  %v35_v16 = vld [vmem:[%s668_s3 + $0x8] sm:$0xff]  ;;  %v512_v22 = vmov 0.0|0.0  }
   0x9   :  { %458 = vmatpush3.bf16.msk.msra.mxu0 %vm576_vm4, %v453_v6  ;;  %v247_v17 = vld [vmem:[%s669_s4 + $0x8] sm:$0xff]  ;;  %477 = vset.pattern.permute.xlu1 %v511_v13  ;;  %v36_v18 = vld [vmem:[%s668_s3 + $0x10] sm:$0xff]  ;;  %v249_v19 = vld [vmem:[%s669_s4 + $0x18] sm:$0x1]  ;;  %vm513_vm6 = vmmov 0   ;;  %v514_v23 = vmov 0.0  }
   0xa   :  { %262 = vperm.xlu1 %477, %v248_v14   ;;  %v37_v20 = vld [vmem:[%s668_s3 + $0x18] sm:$0x1]  ;;  %v279_v21 = vld [vmem:[%s671_s6] sm:$0xff]  ;;  %459 = vmatprep.subr.bf16.mxu1 %v512_v22  ;;  %vm361_vm7 = vcmask 130048   ;;  %vm365_vm8 = vcmask 122880   ;;  %s515_s21 = smov [#allocation2]  }
   0xb   :  { %436 = vmatmul.mubr.msk.f32.gmra.mrb[2].mxu1 %vm144_vm2, %v32_v15  ;;  %v278_v50 = vld [vmem:[%s670_s5] sm:$0xff]  ;;  %s374_s22 = sshll.u32 %s515_s21, 4  ;;  %s375_s22 = int_to_ptr.vmem [resolvable:$true] %s374_s22 }
   0xc   :  { %425 = vmatmul.mubr.msk.f32.vlgmr.msra.gmra.mrb[0].mxu0 %vm42_vm5, %v35_v16  ;;  %257 = vperm.xlu0 %476, %v247_v17   ;;  %s486_s23 = scalar_lea.vmem %s375_s22, 128  ;;  %p491_p1 = scmp.lt.s32.totalorder %s375_s22, %s375_s22 }
   0xd   :  { %427 = vmatprep.mubr.msk.f32.mxu0 %vm42_vm5, %v36_v18  ;;  %446 = vmatprep.mubr.msk.f32.mxu1 %vm513_vm6, %v514_v23  ;;  %p487_p0 = scmp.ne.s32.totalorder %s375_s22, %s486_s23  ;;  %p492_p2 = scmp.lt.s32.totalorder %s486_s23, %s486_s23 }
   0xe   :  { %267 = vperm.xlu1 %477, %v249_v19  }
   0xf   :  { %p493_p3 = por %p492_p2, %p491_p1 }
  0x10   :  { %428 = vmatmul.mubr.msk.f32.gmra.mrb[2].mxu0 %vm42_vm5, %v37_v20  ;;  %282 = vperm.xlu0 %476, %v279_v21  }
  0x11   :  { %p494_p4 = pnand %p493_p3, %p487_p0 }
  0x87   :  { %v253_v25 = vpop.permute.xlu0 %252 }
  0x89   :  { %v263_v27 = vpop.permute.xlu1 %262 }
  0x8b   :  { %v258_v33 = vpop.permute.xlu0 %257 }
  0x8d   :  { %v268_v40 = vpop.permute.xlu1 %267 }
  0x8f   :  { %v283_v51 = vpop.permute.xlu0 %282 }
  0xda   :  { %v434_v24 = vpop.f32.mrb[0].mxu1 }
  0xdb   :  { %v227_v26 = vpop.f32.mrb[1].mxu1 }
  0xde   :  { %v437_v28 = vpop.f32.mrb[2].mxu1 }
  0xdf   :  { %v426_v29 = vpop.f32.mrb[0].mxu0  ;;  %v237_v30 = vpop.f32.mrb[3].mxu1 }
  0xe0   :  { %v233_v31 = vadd.f32 %v434_v24, %v426_v29  ;;  %v125_v32 = vpop.f32.mrb[1].mxu0 }
  0xe1   :  { %v228_v34 = vadd.f32 %v227_v26, %v125_v32 }
  0xe2   :  { %v271_v35 = vadd.f32 %v258_v33, %v233_v31 }
  0xe3   :  { %v270_v36 = vadd.f32 %v253_v25, %v228_v34  ;;  %v429_v37 = vpop.f32.mrb[2].mxu0 }
  0xe4   :  { %478 = vtanh.f32 %v271_v35  ;;  %v243_v38 = vadd.f32 %v437_v28, %v429_v37  ;;  %v135_v39 = vpop.f32.mrb[3].mxu0 }
  0xe5   :  { %480 = vtanh.f32 %v270_v36  ;;  %v238_v41 = vadd.f32 %v237_v30, %v135_v39 }
  0xe6   :  { %v273_v42 = vadd.f32 %v268_v40, %v243_v38 }
  0xe7   :  { %v272_v43 = vadd.f32 %v263_v27, %v238_v41 }
  0xe8   :  { %482 = vtanh.f32 %v273_v42 }
  0xe9   :  { %484 = vtanh.f32 %v272_v43 }
  0xee   :  { %v479_v44 = vpop.eup %478 }
  0xef   :  { %v481_v45 = vpop.eup %480  ;;  %363 = vst.msk [vmem:[%s673_s8 + $0x8] sm:$0xff] %vm361_vm7, %v479_v44 }
  0xf0   :  { %v460_v46 = vpack.c.bf16 %v479_v44, %v481_v45  ;;  %362 = vst.msk [vmem:[%s673_s8] sm:$0xff] %vm361_vm7, %v481_v45 }
  0xf2   :  { %v483_v47 = vpop.eup %482  ;;  %461 = vmatpush3.bf16.msra.mxu1 %v460_v46 }
  0xf3   :  { %v485_v48 = vpop.eup %484  ;;  %366 = vst.msk [vmem:[%s673_s8 + $0x18] sm:$0x1] %vm365_vm8, %v483_v47  ;;  %462 = vmatprep.subr.bf16.mxu1 %v512_v22 }
  0xf4   :  { %v463_v49 = vpack.c.bf16 %v483_v47, %v485_v48  ;;  %364 = vst.msk [vmem:[%s673_s8 + $0x10] sm:$0xff] %vm361_vm7, %v485_v48 }
  0xf6   :  { %465 = vmatpush3.bf16.msk.msra.mxu1 %vm576_vm4, %v463_v49 }
  0xf9   :  { %447 = vmatmul.mubr.msk.f32.vlgmr.msra.gmra.mrb[4].mxu1 %vm42_vm5, %v278_v50 }
 0x1cc   :  { %v357_v52 = vpop.f32.mrb[4].mxu1 }
 0x1cd   :  { %v358_v53 = vadd.f32 %v357_v52, %v283_v51  ;;  %v448_v54 = vpop.f32.mrb[5].mxu1 }
 0x1cf   :  { %367 = vst.msk [vmem:[#allocation2] sm:$0xff] %vm361_vm7, %v358_v53 }
 0x1d0   :  { %497 = shalt.err (!%p494_p4)
}
 0x1d1   :  { %s498_s24 = scalar_lea.hbm %s672_s7, 128 }
 0x1d2   :  { %p499_p5 = scmp.ne.s32.totalorder %s672_s7, %s498_s24  ;;  %p502_p6 = scmp.lt.u32.totalorder %s498_s24, %s672_s7 }
 0x1d4   :  { %p504_p7 = pnand %p502_p6, %p499_p5 }
 0x1d6   :  { %507 = shalt.err (!%p504_p7)
}
 0x1d7   :  { %377 = dma.vmem_to_hbm [thread:$0]  %s375_s22, 128, %s672_s7, [#allocation3]  }
 0x1d8   :  { %508 = dma.done.wait [#allocation3], 128  }
 0x1d9   :  { %509 = vsyncadd [#allocation3], 4294967168 }
 0x1da   :  { %385 = vsyncpa [#allocation3], 1 }

</bundles_post_ra>
